<compile_context>
chip_gen: v5e
topology: v5e:2x2
jax: 0.10.0
libtpu: 0.0.40
codegen_flags: <defaults>
</compile_context>

<pallas_src>
import functools

import jax
import jax.numpy as jnp
from jax.experimental import pallas as pl
from jax.experimental.pallas import tpu as pltpu

N_KEYPOINTS = 17


def _round_up(x, m):
    return (x + m - 1) // m * m


def _make_head_kernel(n_stacks):
    """Kernel body: all stacks' 1x1 convs for one (batch, hw-tile) block."""

    def kernel(w_ref, b_ref, *refs):
        # w_ref: (S, K, C) f32, b_ref: (S, K, 1) f32
        # refs: x_0..x_{S-1} each (C, T), then o_0..o_{S-1} each (K, T).
        x_refs = refs[:n_stacks]
        o_refs = refs[n_stacks:]
        for s in range(n_stacks):
            acc = jnp.dot(
                w_ref[s], x_refs[s][...], preferred_element_type=jnp.float32
            )
            # Bias add stays in f32; only the final lane-dense store casts
            # (v5e has no bf16 VPU, and this keeps its single vst slot wide).
            o_refs[s][...] = (acc + b_ref[s]).astype(o_refs[s].dtype)

    return kernel


def _vmem_caps():
    """(block working-set budget, vmem_limit ceiling) from device VMEM size."""
    try:
        info = pltpu.get_tpu_info()
        cap = int(getattr(info, "vmem_capacity_bytes", 0)) or (64 << 20)
    except Exception:
        cap = 64 << 20  # v7x-safe lower bound; v5e/v6e have 128 MiB
    budget = min(int(cap * 0.70), 96 << 20)
    ceiling = min(int(cap * 0.85), 112 << 20)
    return budget, ceiling


def _plan_tiling(hw_pad, n_batch, n_stacks, c_in, k_out, in_bytes, out_bytes,
                 max_tile=16384):
    """Largest lane-dense HW tile that fits the VMEM budget + matching limit."""
    budget, ceiling = _vmem_caps()
    k_sub = _round_up(k_out, 8)
    # Double-buffered bytes per HW column for all stacks' input+output blocks.
    per_col = 2 * n_stacks * (c_in * in_bytes + k_sub * out_bytes)
    # Weights + bias (charge 2 buffers even though their index_map is constant
    # and Mosaic only DMAs them once).
    params = 2 * n_stacks * (k_sub * max(c_in, 128) * 4 + k_sub * 128 * 4)
    avail = max(budget - params, per_col * 128)
    cap = max(128, min(max_tile, (avail // per_col) // 128 * 128))
    # v7x has 2 TensorCores: ensure a batch==1 launch still has >=2 grid steps.
    if n_batch == 1 and hw_pad >= 256 and hw_pad <= cap:
        cap = min(cap, hw_pad // 2 // 128 * 128)
    if hw_pad <= cap:
        tile = hw_pad
    else:
        tile = cap
        while hw_pad % tile != 0:  # largest 128-multiple <= cap dividing hw_pad
            tile -= 128
    vmem_limit = int(min(ceiling, params + per_col * tile + (8 << 20)))
    vmem_limit = max(vmem_limit, 16 << 20)
    return tile, vmem_limit


@functools.partial(
    jax.jit, static_argnames=("tile_hw", "vmem_limit", "out_dtype")
)
def _heads_fused(w_all, b_all, *xs, tile_hw, vmem_limit, out_dtype):
    """w_all: (S,K,C) f32, b_all: (S,K,1) f32, xs: S arrays (N,C,HW_pad).

    Returns a tuple of S arrays of shape (N, K, HW_pad), already NCHW-flat.
    """
    s_stacks, k_out, c_in = w_all.shape
    n_batch, _, hw = xs[0].shape
    grid = (n_batch, hw // tile_hw)

    w_spec = pl.BlockSpec((s_stacks, k_out, c_in), lambda n, p: (0, 0, 0))
    b_spec = pl.BlockSpec((s_stacks, k_out, 1), lambda n, p: (0, 0, 0))
    x_spec = pl.BlockSpec((pl.Squeezed(), c_in, tile_hw), lambda n, p: (n, 0, p))
    o_spec = pl.BlockSpec((pl.Squeezed(), k_out, tile_hw), lambda n, p: (n, 0, p))

    out_shape = tuple(
        jax.ShapeDtypeStruct((n_batch, k_out, hw), out_dtype)
        for _ in range(s_stacks)
    )

    # TODO(synk): if very large C / S at big tile_hw ever exceeds v7x's 64 MiB,
    # move the stack loop into a third grid axis instead of keeping all S input
    # blocks resident per step (same DMA bytes, ~0.35 us/step extra overhead).
    return pl.pallas_call(
        _make_head_kernel(s_stacks),
        out_shape=out_shape,
        grid_spec=pltpu.PrefetchScalarGridSpec(
            num_scalar_prefetch=0,
            grid=grid,
            in_specs=[w_spec, b_spec] + [x_spec] * s_stacks,
            out_specs=tuple(o_spec for _ in range(s_stacks)),
        ),
        compiler_params=pltpu.CompilerParams(
            dimension_semantics=("parallel", "parallel"),
            vmem_limit_bytes=vmem_limit,
        ),
    )(w_all, b_all, *xs)


class HeatMapsHeadPallas:
    """JAX/Pallas re-implementation of HeatMapsHead (kernel_size=1, padding=0)."""

    stride = 4
    n_keypoints = N_KEYPOINTS
    include_background = False
    bg_channel = 1
    include_jitter_offset = False
    jo_channel = 2

    def __init__(self, head_name, inp_dim, n_stacks, key, out_dtype=jnp.float32):
        self.head_name = head_name
        self.inp_dim = inp_dim
        self.n_stacks = n_stacks
        # bf16 output halves output-store HBM traffic (>50% of total at C=32);
        # default f32 matches the PyTorch module's output dtype.
        self.out_dtype = out_dtype
        # Parameter init mimicking Conv2d 1x1: weight (K, C), bias (K,).
        bound = 1.0 / (inp_dim ** 0.5)
        ws, bs = [], []
        for s in range(n_stacks):
            kw, kb = jax.random.split(jax.random.fold_in(key, s))
            ws.append(jax.random.uniform(
                kw, (self.n_keypoints, inp_dim), jnp.float32, -bound, bound))
            bs.append(jax.random.uniform(
                kb, (self.n_keypoints, 1), jnp.float32, -bound, bound))
        # Params stay f32: tiny & resident; MXU passes are not the bottleneck
        # in this HBM-bound regime, and no activation cast copies are needed.
        self.w_all = jnp.stack(ws)   # (S, K, C) f32
        self.b_all = jnp.stack(bs)   # (S, K, 1) f32
        # TODO(synk): include_background / include_jitter_offset are disabled by
        # class config (matching PyTorch defaults); enabling them would simply
        # add output rows to w_all/b_all (same fused kernel, more channels).

    def __call__(self, args):
        assert len(args) == self.n_stacks, "multiple outputs from BaseNet"
        n, c, h, w = args[0].shape
        assert c == self.inp_dim
        for x in args:
            assert x.shape == (n, c, h, w)
        hw = h * w
        hw_pad = _round_up(hw, 128)  # lane-dense output stores on all gens
        # NCHW is already (N, C, H*W) contiguous: reshape only, no transpose,
        # and no dtype copy -- the kernel reads the native dtype directly.
        xs = []
        for x in args:
            xf = x.reshape(n, c, hw)
            if hw_pad != hw:
                xf = jnp.pad(xf, ((0, 0), (0, 0), (0, hw_pad - hw)))
            xs.append(xf)
        in_bytes = jnp.dtype(xs[0].dtype).itemsize
        out_bytes = jnp.dtype(self.out_dtype).itemsize
        tile_hw, vmem_limit = _plan_tiling(
            hw_pad, n, self.n_stacks, c, self.n_keypoints, in_bytes, out_bytes)
        outs = _heads_fused(
            self.w_all, self.b_all, *xs,
            tile_hw=tile_hw, vmem_limit=vmem_limit, out_dtype=self.out_dtype)
        out_hmps = [
            o[:, :, :hw].reshape(n, self.n_keypoints, h, w) for o in outs
        ]
        out_bghmps = [[] for _ in range(self.n_stacks)]
        out_jomps = [[] for _ in range(self.n_stacks)]
        return (out_hmps, out_bghmps, out_jomps)


def _reference(args, head):
    """Pure-JAX f32 reference of the 1x1-conv head for verification."""
    w = head.w_all   # (S, K, C) f32
    b = head.b_all   # (S, K, 1) f32
    outs = []
    for s, x in enumerate(args):
        y = jnp.einsum(
            "nchw,kc->nkhw", x, w[s], precision=jax.lax.Precision.HIGHEST
        ) + b[s].reshape(1, -1, 1, 1)
        outs.append(y)
    return outs


def _run_case(head, key, batch, inp_dim, H, W):
    args = [
        jax.random.normal(
            jax.random.fold_in(key, s), (batch, inp_dim, H, W), jnp.float32
        )
        for s in range(head.n_stacks)
    ]
    out_hmps, out_bghmps, out_jomps = head(args)
    out_hmps = [jax.block_until_ready(o) for o in out_hmps]
    refs = _reference(args, head)
    for o, r in zip(out_hmps, refs):
        assert o.shape == (batch, N_KEYPOINTS, H, W), o.shape
        assert jnp.allclose(o.astype(jnp.float32), r, atol=2e-2, rtol=2e-2)
    assert all(isinstance(b, list) and len(b) == 0 for b in out_bghmps)
    assert all(isinstance(j, list) and len(j) == 0 for j in out_jomps)


if __name__ == "__main__":
    key = jax.random.PRNGKey(0)
    n_stacks = 2
    inp_dim = 32

    head = HeatMapsHeadPallas(
        "hmps", inp_dim, n_stacks, key=jax.random.fold_in(key, 123)
    )

    # Case 1: H*W multiple of 128 (no padding needed).
    _run_case(head, jax.random.fold_in(key, 7), batch=2, inp_dim=inp_dim, H=16, W=16)
    # Case 2: H*W not a multiple of 128 -> exercises the lane-dense pad/slice path.
    _run_case(head, jax.random.fold_in(key, 11), batch=2, inp_dim=inp_dim, H=10, W=10)

    print("KERNEL_OK")
</pallas_src>

<mosaic_0001>
module attributes {stable_mosaic.version = 11 : i64} {
  func.func @kernel(%arg0: i32, %arg1: i32, %arg2: memref<2x17x32xf32, #tpu.memory_space<vmem>>, %arg3: memref<2x17x1xf32, #tpu.memory_space<vmem>>, %arg4: memref<1x32x256xf32, #tpu.memory_space<vmem>>, %arg5: memref<1x32x256xf32, #tpu.memory_space<vmem>>, %arg6: memref<1x17x256xf32, #tpu.memory_space<vmem>>, %arg7: memref<1x17x256xf32, #tpu.memory_space<vmem>>) attributes {dimension_semantics = [#tpu.dimension_semantics<parallel>, #tpu.dimension_semantics<parallel>], iteration_bounds = array<i64: 2, 1>, scalar_prefetch = 0 : i64, scratch_operands = 0 : i64, tpu.core_type = #tpu.core_type<tc>, window_params = [{pipeline_mode = #tpu.pipeline_mode<synchronous>, transform_indices = @transform_0, window_bounds = array<i64: 2, 17, 32>}, {pipeline_mode = #tpu.pipeline_mode<synchronous>, transform_indices = @transform_1, window_bounds = array<i64: 2, 17, 1>}, {transform_indices = @transform_2, window_bounds = array<i64: 1, 32, 256>}, {transform_indices = @transform_3, window_bounds = array<i64: 1, 32, 256>}, {transform_indices = @transform_4, window_bounds = array<i64: 1, 17, 256>}, {transform_indices = @transform_5, window_bounds = array<i64: 1, 17, 256>}]} {
    %c0 = arith.constant 0 : index
    %c0_0 = arith.constant 0 : index
    %c0_1 = arith.constant 0 : index
    %0 = vector.load %arg2[%c0, %c0_0, %c0_1] : memref<2x17x32xf32, #tpu.memory_space<vmem>>, vector<1x17x32xf32>
    %1 = vector.shape_cast %0 : vector<1x17x32xf32> to vector<17x32xf32>
    %c0_2 = arith.constant 0 : index
    %c0_3 = arith.constant 0 : index
    %c0_4 = arith.constant 0 : index
    %2 = vector.load %arg4[%c0_2, %c0_3, %c0_4] : memref<1x32x256xf32, #tpu.memory_space<vmem>>, vector<1x32x256xf32>
    %3 = vector.shape_cast %2 : vector<1x32x256xf32> to vector<32x256xf32>
    %cst = arith.constant dense<0.000000e+00> : vector<17x256xf32>
    %4 = tpu.matmul %1, %3, %cst {dimension_numbers = #tpu.dot_dimension_numbers<[1], [0], [0], [1], [0, 0, 1, 1], [], []>} : vector<17x32xf32>, vector<32x256xf32>, vector<17x256xf32> -> vector<17x256xf32>
    %c0_5 = arith.constant 0 : index
    %c0_6 = arith.constant 0 : index
    %c0_7 = arith.constant 0 : index
    %5 = vector.load %arg3[%c0_5, %c0_6, %c0_7] : memref<2x17x1xf32, #tpu.memory_space<vmem>>, vector<1x17x1xf32>
    %6 = vector.shape_cast %5 : vector<1x17x1xf32> to vector<17x1xf32>
    %7 = vector.broadcast %6 : vector<17x1xf32> to vector<17x256xf32>
    %8 = arith.addf %4, %7 : vector<17x256xf32>
    %c0_8 = arith.constant 0 : index
    %c0_9 = arith.constant 0 : index
    %c0_10 = arith.constant 0 : index
    %9 = vector.load %arg6[%c0_8, %c0_9, %c0_10] : memref<1x17x256xf32, #tpu.memory_space<vmem>>, vector<1x17x256xf32>
    %10 = vector.shape_cast %9 : vector<1x17x256xf32> to vector<17x256xf32>
    %11 = vector.shape_cast %8 : vector<17x256xf32> to vector<1x17x256xf32>
    tpu.vector_store %arg6[%c0_8, %c0_9, %c0_10], %11 {strides = array<i32>} : memref<1x17x256xf32, #tpu.memory_space<vmem>>, vector<1x17x256xf32>,
    %c1 = arith.constant 1 : index
    %c0_11 = arith.constant 0 : index
    %c0_12 = arith.constant 0 : index
    %12 = vector.load %arg2[%c1, %c0_11, %c0_12] : memref<2x17x32xf32, #tpu.memory_space<vmem>>, vector<1x17x32xf32>
    %13 = vector.shape_cast %12 : vector<1x17x32xf32> to vector<17x32xf32>
    %c0_13 = arith.constant 0 : index
    %c0_14 = arith.constant 0 : index
    %c0_15 = arith.constant 0 : index
    %14 = vector.load %arg5[%c0_13, %c0_14, %c0_15] : memref<1x32x256xf32, #tpu.memory_space<vmem>>, vector<1x32x256xf32>
    %15 = vector.shape_cast %14 : vector<1x32x256xf32> to vector<32x256xf32>
    %cst_16 = arith.constant dense<0.000000e+00> : vector<17x256xf32>
    %16 = tpu.matmul %13, %15, %cst_16 {dimension_numbers = #tpu.dot_dimension_numbers<[1], [0], [0], [1], [0, 0, 1, 1], [], []>} : vector<17x32xf32>, vector<32x256xf32>, vector<17x256xf32> -> vector<17x256xf32>
    %c1_17 = arith.constant 1 : index
    %c0_18 = arith.constant 0 : index
    %c0_19 = arith.constant 0 : index
    %17 = vector.load %arg3[%c1_17, %c0_18, %c0_19] : memref<2x17x1xf32, #tpu.memory_space<vmem>>, vector<1x17x1xf32>
    %18 = vector.shape_cast %17 : vector<1x17x1xf32> to vector<17x1xf32>
    %19 = vector.broadcast %18 : vector<17x1xf32> to vector<17x256xf32>
    %20 = arith.addf %16, %19 : vector<17x256xf32>
    %c0_20 = arith.constant 0 : index
    %c0_21 = arith.constant 0 : index
    %c0_22 = arith.constant 0 : index
    %21 = vector.load %arg7[%c0_20, %c0_21, %c0_22] : memref<1x17x256xf32, #tpu.memory_space<vmem>>, vector<1x17x256xf32>
    %22 = vector.shape_cast %21 : vector<1x17x256xf32> to vector<17x256xf32>
    %23 = vector.shape_cast %20 : vector<17x256xf32> to vector<1x17x256xf32>
    tpu.vector_store %arg7[%c0_20, %c0_21, %c0_22], %23 {strides = array<i32>} : memref<1x17x256xf32, #tpu.memory_space<vmem>>, vector<1x17x256xf32>,
    return
  }
  func.func @transform_0(%arg0: i32, %arg1: i32) -> (i32, i32, i32) {
    %c0_i32 = arith.constant 0 : i32
    %c0_i32_0 = arith.constant 0 : i32
    %c0_i32_1 = arith.constant 0 : i32
    %c0_i32_2 = arith.constant 0 : i32
    return %c0_i32, %c0_i32_0, %c0_i32_1 : i32, i32, i32
  }
  func.func @transform_1(%arg0: i32, %arg1: i32) -> (i32, i32, i32) {
    %c0_i32 = arith.constant 0 : i32
    %c0_i32_0 = arith.constant 0 : i32
    %c0_i32_1 = arith.constant 0 : i32
    %c0_i32_2 = arith.constant 0 : i32
    return %c0_i32, %c0_i32_0, %c0_i32_1 : i32, i32, i32
  }
  func.func @transform_2(%arg0: i32, %arg1: i32) -> (i32, i32, i32) {
    %c0_i32 = arith.constant 0 : i32
    %c0_i32_0 = arith.constant 0 : i32
    return %arg0, %c0_i32, %arg1 : i32, i32, i32
  }
  func.func @transform_3(%arg0: i32, %arg1: i32) -> (i32, i32, i32) {
    %c0_i32 = arith.constant 0 : i32
    %c0_i32_0 = arith.constant 0 : i32
    return %arg0, %c0_i32, %arg1 : i32, i32, i32
  }
  func.func @transform_4(%arg0: i32, %arg1: i32) -> (i32, i32, i32) {
    %c0_i32 = arith.constant 0 : i32
    %c0_i32_0 = arith.constant 0 : i32
    return %arg0, %c0_i32, %arg1 : i32, i32, i32
  }
  func.func @transform_5(%arg0: i32, %arg1: i32) -> (i32, i32, i32) {
    %c0_i32 = arith.constant 0 : i32
    %c0_i32_0 = arith.constant 0 : i32
    return %arg0, %c0_i32, %arg1 : i32, i32, i32
  }
}

</mosaic_0001>

<bundles_post_ra>
// kernel: _heads_fused.1
= control target key start
LH: loop header
LB: loop body
LE: loop exit
PB: predicated region body
PF: predicated region fallthrough
CT: control target
= control target key end

     0   :  { %11 = vsyncpa [#allocation3], 0  ;;  %s1069_s0 = inlined_call_operand.vmem [shape: f32[2,17,32], index: 0, kind: input, shape index: {}]   ;;  %s1070_s1 = inlined_call_operand.vmem [shape: f32[2,17,1], index: 1, kind: input, shape index: {}]   ;;  %s1071_s2 = inlined_call_operand.vmem [shape: f32[2,32,256], index: 2, kind: input, shape index: {}]   ;;  %s1072_s3 = inlined_call_operand.hbm [shape: f32[2,32,256], index: 3, kind: input, shape index: {}]   ;;  %s1073_s4 = inlined_call_operand.vmem [shape: f32[2,17,256], index: 4, kind: output, shape index: {0}]   ;;  %s1074_s5 = inlined_call_operand.vmem [shape: f32[2,17,256], index: 5, kind: output, shape index: {1}]  }
   0x1   :  { %13 = vsyncpa [#allocation3 + $0x1], 0  ;;  %s905_s18 = smov 0   ;;  %s907_s19 = smov 0  }
   0x2   :  { %s909_s20 = smov 0   ;;  %s911_s21 = smov 0  }
   0x3   :  { %s913_s22 = smov 0   ;;  %s915_s23 = smov 0  }
   0x4 LB: > { %s693_s24 = sadd.s32 4294967295, %s870_s23   ;;  %s31_s25 = sadd.s32 1, %s866_s22  ;;  %s870_s23 = sphi %s915_s23, %s19_s23   ;;  %s866_s22 = sphi %s913_s22, %s1081_s22   ;;  %s862_s21 = sphi %s911_s21, %s1080_s21   ;;  %s858_s20 = sphi %s909_s20, %s1079_s20   ;;  %s854_s19 = sphi %s907_s19, %s1078_s19   ;;  %s850_s18 = sphi %s905_s18, %s1077_s18  }
   0x5   : > { %p33_p0 = scmp.ge.s32.totalorder %s31_s25, 2  ;;  %s110_s26 = sadd.s32 1, %s858_s20 }
   0x6   : > { %p117_p1 = scmp.ne.s32.totalorder %s858_s20, %s854_s19  ;;  %p118_p2 = scmp.eq.s32.totalorder %s870_s23, 0 }
   0x7   : > { %s1083_s25 = smov (%p33_p0, %s31_s25), 0  ;;  %p123_p4 = scmp.ne.s32.totalorder %s854_s19, %s850_s18 }
   0x8   : > { %p941_p3 = por %p118_p2, %p117_p1  ;;  %s105_s28 = ssub.s32 %s866_s22, %s1083_s25 }
   0x9   : > { %p124_p5 = scmp.eq.s32.totalorder %s693_s24, 0  ;;  %p108_p6 = scmp.eq.s32.totalorder %s105_s28, 0 }
   0xa   : > { %p735_p8 = scmp.lt.s32.totalorder %s870_s23, 2  ;;  %s222_s6 = sand.u32 1, %s858_s20  }
   0xb   : > { %p948_p7 = por %p124_p5, %p123_p4  ;;  %s726_s7 = sshll.u32 %s866_s22, 6 }
   0xc   : > { %s954_s30 = scalar_select %p108_p6, %s858_s20, %s110_s26  }
   0xd   : > { %s697_s8 = sshll.u32 %s222_s6, 6  ;;  %s233_s11 = scalar_lea.hbm %s1072_s3, %s726_s7 }
   0xe   : > { %s234_s12 = sshll.u32 %s233_s11, 4  ;;  %s226_s13 = scalar_lea.vmem [#allocation2], %s697_s8  ;;  %s235_s12 = int_to_ptr.hbm [resolvable:$true] %s234_s12 }
   0xf   : > { %s236_s14 = sshll.u32 %s226_s13, 4  ;;  %p732_p9 = pnand %p735_p8, %p941_p3  ;;  %s237_s14 = int_to_ptr.vmem [resolvable:$true] %s236_s14 }
  0x10   : > { %p700_p10 = scmp.ge.s32.totalorder %s870_s23, 1  ;;  %p244_p11 = scmp.lt.s32.totalorder %s870_s23, 3 }
  0x11   : > { %s223_s15 = scalar_lea.sflag [#allocation3], %s222_s6  ;;  %s872_s16 = smov 256  }
  0x12   : > { %s873_s17 = smov 16   ;;  %p245_p12 = pnand %p700_p10, %p244_p11 }
  0x13   : > { %734 = dma.hbm_to_vmem [thread:$0]  (!%p732_p9), %s235_s12, 1024, %s237_s14, %s223_s15, %s872_s16, %s872_s16, %s873_s17  }
  0x14   : > { %248 = sbr.rel (%p245_p12) target bundleno = 189 (0xbd), region = 36  ;;  %s250_s18 = sand.u32 (!%p245_p12), 1, %s854_s19  }
  0x15   : > { %s701_s24 = sshll.u32 (!%p245_p12), %s250_s18, 6  ;;  %s251_s26 = scalar_lea.sflag (!%p245_p12), [#allocation3], %s250_s18 }
  0x16   : > { %s966_s28 = scalar_lea.vmem (!%p245_p12), [#allocation2], %s701_s24 }
  0x19   : > { %845 = dma.done.wait (%p948_p7), %s251_s26, 1024  }
  0x1a   : > { %847 = vsyncadd (%p948_p7), %s251_s26, 4294966272  ;;  %p305_p13 = scmp.lt.s32.totalorder %s862_s21, 1  ;;  %v874_v0 = vmov 0   ;;  %v442_v3 = vld [vmem:[%s966_s28 + $0x30] sm:$0xff]  ;;  %v443_v4 = vld [vmem:[%s966_s28 + $0x38] sm:$0xff]  ;;  %vm364_vm0 = vcmask 261120  }
  0x1b   : > { %788 = vset.pattern.permute.xlu1 %v874_v0  ;;  %787 = vset.pattern.permute.xlu0 %v874_v0  ;;  %v440_v7 = vld [vmem:[%s966_s28 + $0x20] sm:$0xff]  ;;  %v441_v8 = vld [vmem:[%s966_s28 + $0x28] sm:$0xff]  ;;  %v438_v11 = vld [vmem:[%s966_s28 + $0x10] sm:$0xff] }
  0x1c   : > { %s1085_s21 = smov (!%p305_p13, %s862_s21), 1  ;;  %789 = vset.pattern.permute.xlu2 %v874_v0  ;;  %484 = vmatpush.msra.mxu2 %v442_v3  ;;  %v439_v12 = vld [vmem:[%s966_s28 + $0x18] sm:$0xff]  ;;  %v436_v15 = vld [vmem:[%s966_s28] sm:$0xff]  ;;  %v437_v16 = vld [vmem:[%s966_s28 + $0x8] sm:$0xff] }
  0x1d   : > { %s727_s27 = sshll.u32 %s1085_s21, 6  ;;  %510 = vmatpush.msra.mxu3 %v443_v4  ;;  %v335_v17 = vld [vmem:[%s1069_s0] sm:$0xff]  ;;  %v712_v18 = vld [vmem:[%s1069_s0 + $0x18] sm:$0xff]  ;;  %v348_v19 = vld [vmem:[%s1070_s1 + $0x10] sm:$0x1]  ;;  %s728_s14 = smul.u32 48, %s1085_s21 }
  0x1e   : > { %s312_s29 = scalar_lea.vmem %s1071_s2, %s727_s27  ;;  %485 = vmatpush.msra.mxu2 %v440_v7  ;;  %v346_v20 = vld [vmem:[%s1070_s1] sm:$0xff]  ;;  %361 = vperm.xlu1 %788, %v348_v19   ;;  %v336_v22 = vld [vmem:[%s1069_s0 + $0x8] sm:$0xff]  ;;  %v715_v24 = vld [vmem:[%s1070_s1 + $0x18] sm:$0xff] }
  0x1f   : > { %v344_v1 = vld [vmem:[%s312_s29 + $0x30] sm:$0xff]  ;;  %v345_v2 = vld [vmem:[%s312_s29 + $0x38] sm:$0xff]  ;;  %v342_v5 = vld [vmem:[%s312_s29 + $0x20] sm:$0xff]  ;;  %511 = vmatpush.msra.mxu3 %v441_v8  ;;  %351 = vperm.xlu0 %787, %v346_v20   ;;  %s1040_s17 = scalar_lea.vmem %s1073_s4, %s728_s14  ;;  %s333_s24 = scalar_lea.vmem %s1074_s5, %s728_s14 }
  0x20   : > { %386 = vmatpush.msra.mxu0 %v344_v1  ;;  %412 = vmatpush.msra.mxu1 %v345_v2  ;;  %v343_v6 = vld [vmem:[%s312_s29 + $0x28] sm:$0xff]  ;;  %v340_v9 = vld [vmem:[%s312_s29 + $0x10] sm:$0xff]  ;;  %v341_v10 = vld [vmem:[%s312_s29 + $0x18] sm:$0xff] }
  0x21   : > { %v338_v13 = vld [vmem:[%s312_s29] sm:$0xff]  ;;  %v339_v14 = vld [vmem:[%s312_s29 + $0x8] sm:$0xff]  ;;  %486 = vmatpush.msra.mxu2 %v438_v11  ;;  %512 = vmatpush.msra.mxu3 %v439_v12  ;;  %v337_v27 = vld [vmem:[%s1069_s0 + $0x10] sm:$0x1] }
  0x22   : > { %387 = vmatpush.msra.mxu0 %v342_v5  ;;  %413 = vmatpush.msra.mxu1 %v343_v6  ;;  %v716_v21 = vld [vmem:[%s1070_s1 + $0x20] sm:$0xff]  ;;  %v347_v25 = vld [vmem:[%s1070_s1 + $0x8] sm:$0xff] }
  0x23   : > { %487 = vmatpush.msra.mxu2 %v436_v15  ;;  %513 = vmatpush.msra.mxu3 %v437_v16  ;;  %v713_v23 = vld [vmem:[%s1069_s0 + $0x20] sm:$0xff]  ;;  %v717_v26 = vld [vmem:[%s1070_s1 + $0x28] sm:$0x1] }
  0x24   : > { %388 = vmatpush.msra.mxu0 %v340_v9  ;;  %414 = vmatpush.msra.mxu1 %v341_v10  ;;  %v714_v28 = vld [vmem:[%s1069_s0 + $0x28] sm:$0x1] }
  0x25   : > { %718 = vmatmul.msk.f32.vlgmr.msra.gmra.mxu2 %vm364_vm0, %v712_v18  ;;  %721 = vmatmul.msk.f32.vlgmr.msra.gmra.mxu3 %vm364_vm0, %v712_v18 }
  0x26   : > { %389 = vmatpush.msra.mxu0 %v338_v13  ;;  %415 = vmatpush.msra.mxu1 %v339_v14 }
  0x27   : > { %706 = vmatmul.msk.f32.vlgmr.msra.gmra.mxu0 %vm364_vm0, %v335_v17  ;;  %709 = vmatmul.msk.f32.vlgmr.msra.gmra.mxu1 %vm364_vm0, %v335_v17 }
  0x28   : > { %455 = vperm.xlu2 %789, %v716_v21   ;;  %450 = vperm.xlu1 %788, %v715_v24  }
  0x29   : > { %356 = vperm.xlu0 %787, %v347_v25  }
  0x2d   : > { %719 = vmatmul.msk.f32.gmra.mxu2 %vm364_vm0, %v713_v23  ;;  %722 = vmatmul.msk.f32.gmra.mxu3 %vm364_vm0, %v713_v23 }
  0x2f   : > { %707 = vmatmul.msk.f32.gmra.mxu0 %vm364_vm0, %v336_v22  ;;  %710 = vmatmul.msk.f32.gmra.mxu1 %vm364_vm0, %v336_v22 }
  0x30   : > { %460 = vperm.xlu2 %789, %v717_v26  }
  0x35   : > { %720 = vmatmul.msk.f32.gmra.mxu2 %vm364_vm0, %v714_v28  ;;  %723 = vmatmul.msk.f32.gmra.mxu3 %vm364_vm0, %v714_v28 }
  0x37   : > { %708 = vmatmul.msk.f32.gmra.mxu0 %vm364_vm0, %v337_v27  ;;  %711 = vmatmul.msk.f32.gmra.mxu1 %vm364_vm0, %v337_v27 }
  0x82   : > { %v456_v45 = vpop.permute.xlu2 %455 }
  0x8a   : > { %v461_v54 = vpop.permute.xlu2 %460 }
  0x90   : > { %v362_v29 = vpop.permute.xlu1 %361 }
  0x91   : > { %v352_v30 = vpop.permute.xlu0 %351 }
  0x9a   : > { %v451_v35 = vpop.permute.xlu1 %450 }
  0x9b   : > { %v357_v36 = vpop.permute.xlu0 %356 }
  0xa4   : > { %v391_v31 = vpop.f32.mrf.mxu0  ;;  %v417_v32 = vpop.f32.mrf.mxu1 }
  0xa5   : > { %v392_v33 = vadd.f32 %v391_v31, %v352_v30  ;;  %v418_v34 = vadd.f32 %v417_v32, %v352_v30 }
  0xa7   : > { %426 = vst [vmem:[%s1040_s17] sm:$0xff] %v392_v33 }
  0xa8   : > { %427 = vst [vmem:[%s1040_s17 + $0x8] sm:$0xff] %v418_v34  ;;  %v489_v37 = vpop.f32.mrf.mxu2  ;;  %v515_v38 = vpop.f32.mrf.mxu3 }
  0xa9   : > { %v490_v39 = vadd.f32 %v489_v37, %v451_v35  ;;  %v516_v40 = vadd.f32 %v515_v38, %v451_v35 }
  0xab   : > { %524 = vst [vmem:[%s333_s24] sm:$0xff] %v490_v39 }
  0xac   : > { %v394_v41 = vpop.f32.mrf.mxu0  ;;  %v420_v42 = vpop.f32.mrf.mxu1  ;;  %525 = vst [vmem:[%s333_s24 + $0x8] sm:$0xff] %v516_v40 }
  0xad   : > { %v395_v43 = vadd.f32 %v394_v41, %v357_v36  ;;  %v421_v44 = vadd.f32 %v420_v42, %v357_v36 }
  0xaf   : > { %428 = vst [vmem:[%s1040_s17 + $0x10] sm:$0xff] %v395_v43 }
  0xb0   : > { %429 = vst [vmem:[%s1040_s17 + $0x18] sm:$0xff] %v421_v44  ;;  %v492_v46 = vpop.f32.mrf.mxu2  ;;  %v518_v47 = vpop.f32.mrf.mxu3 }
  0xb1   : > { %v493_v48 = vadd.f32 %v492_v46, %v456_v45  ;;  %v519_v49 = vadd.f32 %v518_v47, %v456_v45 }
  0xb3   : > { %526 = vst [vmem:[%s333_s24 + $0x10] sm:$0xff] %v493_v48 }
  0xb4   : > { %v397_v50 = vpop.f32.mrf.mxu0  ;;  %v423_v51 = vpop.f32.mrf.mxu1  ;;  %527 = vst [vmem:[%s333_s24 + $0x18] sm:$0xff] %v519_v49 }
  0xb5   : > { %v398_v52 = vadd.f32 %v397_v50, %v362_v29  ;;  %v424_v53 = vadd.f32 %v423_v51, %v362_v29 }
  0xb7   : > { %430 = vst [vmem:[%s1040_s17 + $0x20] sm:$0x1] %v398_v52 }
  0xb8   : > { %431 = vst [vmem:[%s1040_s17 + $0x28] sm:$0x1] %v424_v53  ;;  %v495_v55 = vpop.f32.mrf.mxu2  ;;  %v521_v56 = vpop.f32.mrf.mxu3 }
  0xb9   : > { %v496_v57 = vadd.f32 %v495_v55, %v461_v54  ;;  %v522_v58 = vadd.f32 %v521_v56, %v461_v54 }
  0xbb   : > { %528 = vst [vmem:[%s333_s24 + $0x20] sm:$0x1] %v496_v57 }
  0xbc   : > { %529 = vst [vmem:[%s333_s24 + $0x28] sm:$0x1] %v522_v58 }
  0xbd PF: > { %s19_s23 = sadd.s32 1, %s870_s23   ;;  %s1077_s18 = smov %s854_s19 }
  0xbe   : > { %p16_p0 = scmp.ge.s32.totalorder %s19_s23, 4   ;;  %s1078_s19 = smov %s858_s20 }
  0xbf   : > { %s1079_s20 = smov %s954_s30  ;;  %s1080_s21 = smov %s866_s22 }
  0xc0   : > { %s1081_s22 = smov %s1083_s25  ;;  %18 = sbr.rel (!%p16_p0) target bundleno = 4 (0x4), region = 93 }
  0xc5   :  { %585 = vsyncpa [#allocation3], 1 }
  0xc6   :  { %587 = vsyncpa [#allocation3 + $0x1], 1 }

</bundles_post_ra>
